<compile_context>
chip_gen: v7x
topology: tpu7x:2x2x1
jax: 0.10.0
libtpu: 0.0.40
codegen_flags: <defaults>
</compile_context>

<pallas_src>
import functools
import math

import jax
import jax.numpy as jnp
from jax.experimental import pallas as pl
from jax.experimental.pallas import tpu as pltpu


def _round_up(x, m):
    return ((x + m - 1) // m) * m


def _apply_activation(acc, activation):
    if activation == "leaky_relu":
        return jnp.where(acc >= 0.0, acc, 0.2 * acc)
    if activation == "sigmoid":
        return jax.nn.sigmoid(acc)
    return acc


# ----------------------------------------------------------------------------
# Pallas kernels: fused (matmul + folded-BN bias + activation)
# ----------------------------------------------------------------------------
def _fused_matmul_single_k(p_ref, w_ref, b_ref, o_ref, *, activation):
    # Whole K slab resident in VMEM: one dot, epilogue, store.
    acc = jnp.dot(p_ref[...], w_ref[...], preferred_element_type=jnp.float32)
    acc = acc + b_ref[...]
    o_ref[...] = _apply_activation(acc, activation).astype(o_ref.dtype)


def _fused_matmul_multi_k(p_ref, w_ref, b_ref, o_ref, acc_ref, *, activation):
    k = pl.program_id(2)

    @pl.when(k == 0)
    def _():
        acc_ref[...] = jnp.zeros_like(acc_ref)

    acc_ref[...] += jnp.dot(p_ref[...], w_ref[...],
                            preferred_element_type=jnp.float32)

    @pl.when(k == pl.num_programs(2) - 1)
    def _():
        acc = acc_ref[...] + b_ref[...]
        o_ref[...] = _apply_activation(acc, activation).astype(o_ref.dtype)


# ----------------------------------------------------------------------------
# Tile selection (VMEM-budgeted, megacore-aware)
# ----------------------------------------------------------------------------
_VMEM_TILE_BUDGET = 16 * 1024 * 1024      # double-buffered working set target
_VMEM_LIMIT_BYTES = 48 * 1024 * 1024      # <= 64 MiB physical on v7x
_MIN_PALLAS_ROWS = 16                     # below this, XLA handles it better


def _choose_tiles(M, K_pad, Cout):
    # Output tile: full Cout when it isn't lane-aligned (it's then the full
    # array dim, which is legal); otherwise 128/256-wide lane-dense stores.
    if Cout % 128 == 0:
        tn = 256 if Cout % 256 == 0 else 128
    else:
        tn = Cout
    tm = min(512, _round_up(M, 8))

    # Largest K tile that (a) divides K_pad in 128-lane units and (b) keeps the
    # double-buffered working set within budget.  tk == K_pad collapses the K
    # grid axis entirely.
    q = K_pad // 128
    tk = 128
    for d in range(q, 0, -1):
        if q % d:
            continue
        cand = 128 * d
        ws = (2 * (tm * cand + cand * tn) * 2      # bf16 input double-buffers
              + tm * tn * 4                        # f32 accumulator
              + 2 * tm * tn * 2)                   # bf16 output double-buffer
        if ws <= _VMEM_TILE_BUDGET:
            tk = cand
            break

    # v7x has 2 TensorCores: make sure the parallel (i, j) grid has >= 2
    # blocks so both cores get work (no effect on v5e/v6e correctness).
    def _nblocks(tm_):
        return pl.cdiv(_round_up(M, 8), tm_) * pl.cdiv(Cout, tn)

    while _nblocks(tm) < 2 and tm > 8:
        tm = max(8, _round_up(tm // 2, 8))
    return tm, tk, tn


def fused_conv_matmul(patches, w_mat, bias_vec, activation,
                      out_dtype=jnp.bfloat16):
    """(M, K_pad) bf16 @ (K_pad, Cout) bf16 + bias -> activation -> (M, Cout)."""
    M, K_pad = patches.shape
    K_pad2, Cout = w_mat.shape
    assert K_pad == K_pad2 and K_pad % 128 == 0

    tm, tk, tn = _choose_tiles(M, K_pad, Cout)
    M_pad = _round_up(M, tm)
    if M_pad != M:
        patches = jnp.pad(patches, ((0, M_pad - M), (0, 0)))

    mb, nb, kb = M_pad // tm, pl.cdiv(Cout, tn), K_pad // tk
    bias2d = bias_vec.reshape(1, Cout).astype(jnp.float32)
    out_shape = jax.ShapeDtypeStruct((M_pad, Cout), out_dtype)

    if kb == 1:
        out = pl.pallas_call(
            functools.partial(_fused_matmul_single_k, activation=activation),
            out_shape=out_shape,
            grid=(mb, nb),
            in_specs=[
                pl.BlockSpec((tm, tk), lambda i, j: (i, 0)),
                pl.BlockSpec((tk, tn), lambda i, j: (0, j)),
                pl.BlockSpec((1, tn), lambda i, j: (0, j)),
            ],
            out_specs=pl.BlockSpec((tm, tn), lambda i, j: (i, j)),
            compiler_params=pltpu.CompilerParams(
                dimension_semantics=("parallel", "parallel"),
                vmem_limit_bytes=_VMEM_LIMIT_BYTES,
            ),
        )(patches, w_mat, bias2d)
    else:
        out = pl.pallas_call(
            functools.partial(_fused_matmul_multi_k, activation=activation),
            out_shape=out_shape,
            grid=(mb, nb, kb),
            in_specs=[
                pl.BlockSpec((tm, tk), lambda i, j, k: (i, k)),
                pl.BlockSpec((tk, tn), lambda i, j, k: (k, j)),
                pl.BlockSpec((1, tn), lambda i, j, k: (0, j)),
            ],
            out_specs=pl.BlockSpec((tm, tn), lambda i, j, k: (i, j)),
            scratch_shapes=[pltpu.VMEM((tm, tn), jnp.float32)],
            compiler_params=pltpu.CompilerParams(
                dimension_semantics=("parallel", "parallel", "arbitrary"),
                vmem_limit_bytes=_VMEM_LIMIT_BYTES,
            ),
        )(patches, w_mat, bias2d)

    return out[:M] if M_pad != M else out


# ----------------------------------------------------------------------------
# Host-side glue: im2col for 3x3x3 conv, padding 1, arbitrary stride
# ----------------------------------------------------------------------------
def im2col_3d(x_ndhwc, stride, k_pad):
    """Returns (M, k_pad) bf16 patches (K tail zero-padded in the same pass)."""
    N, D, H, W, C = x_ndhwc.shape
    sd, sh, sw = stride
    xp = jnp.pad(x_ndhwc, ((0, 0), (1, 1), (1, 1), (1, 1), (0, 0)))
    Do = (D + 2 - 3) // sd + 1
    Ho = (H + 2 - 3) // sh + 1
    Wo = (W + 2 - 3) // sw + 1
    cols = []
    for kd in range(3):
        for kh in range(3):
            for kw in range(3):
                sl = xp[:, kd:kd + sd * (Do - 1) + 1:sd,
                        kh:kh + sh * (Ho - 1) + 1:sh,
                        kw:kw + sw * (Wo - 1) + 1:sw, :]
                cols.append(sl)
    patches = jnp.stack(cols, axis=-2)                     # (N,Do,Ho,Wo,27,C)
    patches = patches.reshape(N * Do * Ho * Wo, 27 * C)
    if k_pad > 27 * C:                                     # fused with producer
        patches = jnp.pad(patches, ((0, 0), (0, k_pad - 27 * C)))
    return patches, (N, Do, Ho, Wo)


# ----------------------------------------------------------------------------
# One-time parameter preparation (fold BN, transpose, K-pad, bf16 cast)
# ----------------------------------------------------------------------------
_LAYERS = (
    ("w1", "b1", (2, 2, 2), True, "leaky_relu"),
    ("w2", "b2", (2, 2, 2), True, "leaky_relu"),
    ("w3", "b3", (2, 2, 2), True, "leaky_relu"),
    ("w4", "b4", (4, 4, 1), False, "sigmoid"),
)


def prepare_discriminator_params(raw):
    # eval-mode BatchNorm3d with fresh running stats: mean=0, var=1, gamma=1,
    # beta=0  =>  bn(conv(x)) = (W*s) x + b*s, s = 1/sqrt(1+eps).
    # TODO(synk): if trained BN stats / training-mode batch statistics are
    #             required, build scale/shift from running_mean/var/gamma/beta.
    eps = 1e-5
    prepared = []
    for wn, bname, stride, has_bn, act in _LAYERS:
        w, b = raw[wn], raw[bname]
        cout, cin = w.shape[0], w.shape[1]
        K = 27 * cin
        k_pad = _round_up(K, 128)
        scale = 1.0 / math.sqrt(1.0 + eps) if has_bn else 1.0
        w_mat = jnp.transpose(w, (2, 3, 4, 1, 0)).reshape(K, cout) * scale
        w_mat = jnp.pad(w_mat, ((0, k_pad - K), (0, 0))).astype(jnp.bfloat16)
        prepared.append(dict(w=w_mat, b=(b * scale).astype(jnp.float32),
                             stride=stride, act=act, k_pad=k_pad, cout=cout))
    return prepared


# ----------------------------------------------------------------------------
# Discriminator forward (inference semantics: BN running stats, dropout off)
# ----------------------------------------------------------------------------
def conv_block(x_ndhwc, layer):
    patches, (N, Do, Ho, Wo) = im2col_3d(x_ndhwc, layer["stride"],
                                         layer["k_pad"])
    M = patches.shape[0]
    if M < _MIN_PALLAS_ROWS:
        # Tiny-M regime (e.g. layer 3 at the demo shapes): a Pallas call is
        # pure launch overhead; let XLA fuse the GEMM + epilogue.
        acc = jnp.dot(patches, layer["w"],
                      preferred_element_type=jnp.float32)
        acc = acc + layer["b"].reshape(1, -1)
        out = _apply_activation(acc, layer["act"]).astype(jnp.bfloat16)
    else:
        out = fused_conv_matmul(patches, layer["w"], layer["b"], layer["act"])
    return out.reshape(N, Do, Ho, Wo, layer["cout"])


def final_conv_sigmoid(x_ndhwc, layer):
    # conv4 (Cout=1) -> flatten -> sigmoid.  A 1-lane Pallas output would be a
    # fully-masked store path; keep this GEMV in XLA but in bf16 (f32 accum).
    patches, (N, Do, Ho, Wo) = im2col_3d(x_ndhwc, layer["stride"],
                                         layer["k_pad"])
    logits = jnp.dot(patches, layer["w"], preferred_element_type=jnp.float32)
    logits = logits + layer["b"].reshape(1, -1)
    out = logits.reshape(N, Do, Ho, Wo, 1)
    out = jnp.transpose(out, (0, 4, 1, 2, 3)).reshape(N, -1)  # NCDHW flatten
    return jax.nn.sigmoid(out)


def discriminator_forward(prepared, x, y):
    # x, y: NCDHW (PyTorch convention), 1 channel each.
    inp = jnp.concatenate([x, y], axis=1)                     # (N, 2, D, H, W)
    h = jnp.transpose(inp, (0, 2, 3, 4, 1)).astype(jnp.bfloat16)  # NDHWC bf16
    h = conv_block(h, prepared[0])
    h = conv_block(h, prepared[1])
    h = conv_block(h, prepared[2])
    return final_conv_sigmoid(h, prepared[3])


# ----------------------------------------------------------------------------
# Deterministic parameter init (matches __init__ shapes; xavier_normal, 0 bias)
# ----------------------------------------------------------------------------
def xavier_normal(key, shape):
    cout, cin, kd, kh, kw = shape
    fan_in = cin * kd * kh * kw
    fan_out = cout * kd * kh * kw
    std = math.sqrt(2.0 / (fan_in + fan_out))
    return std * jax.random.normal(key, shape, jnp.float32)


def init_discriminator_params(key):
    ks = jax.random.split(key, 4)
    return {
        "w1": xavier_normal(ks[0], (64, 2, 3, 3, 3)),
        "b1": jnp.zeros((64,), jnp.float32),
        "w2": xavier_normal(ks[1], (128, 64, 3, 3, 3)),
        "b2": jnp.zeros((128,), jnp.float32),
        "w3": xavier_normal(ks[2], (256, 128, 3, 3, 3)),
        "b3": jnp.zeros((256,), jnp.float32),
        "w4": xavier_normal(ks[3], (1, 256, 3, 3, 3)),
        "b4": jnp.zeros((1,), jnp.float32),
    }


if __name__ == "__main__":
    key = jax.random.PRNGKey(0)
    kp, kx, ky = jax.random.split(key, 3)
    raw_params = init_discriminator_params(kp)

    # One-time (hoisted) weight prep: BN fold, transpose, K-pad, bf16 cast.
    prepared = prepare_discriminator_params(raw_params)

    # Small shapes consistent with the module: batch=2, 1 channel each for
    # image / segmentation, spatial (D, H, W) = (16, 16, 8).
    x = jax.random.normal(kx, (2, 1, 16, 16, 8), jnp.float32)
    y = (jax.random.uniform(ky, (2, 1, 16, 16, 8)) > 0.5).astype(jnp.float32)

    fwd = jax.jit(functools.partial(discriminator_forward, prepared))
    out = jax.block_until_ready(fwd(x, y))

    assert out.shape == (2, 1)
    assert bool(jnp.all(jnp.isfinite(out)))
    assert bool(jnp.all((out >= 0.0) & (out <= 1.0)))
    print("KERNEL_OK")
</pallas_src>

<mosaic_0001>
module attributes {stable_mosaic.version = 11 : i64} {
  func.func @_fused_matmul_single_k(%arg0: i32, %arg1: i32, %arg2: memref<256x128xbf16, #tpu.memory_space<vmem>>, %arg3: memref<128x64xbf16, #tpu.memory_space<vmem>>, %arg4: memref<1x64xf32, #tpu.memory_space<vmem>>, %arg5: memref<256x64xbf16, #tpu.memory_space<vmem>>) attributes {dimension_semantics = [#tpu.dimension_semantics<parallel>, #tpu.dimension_semantics<parallel>], iteration_bounds = array<i64: 2, 1>, scalar_prefetch = 0 : i64, scratch_operands = 0 : i64, tpu.core_type = #tpu.core_type<tc>, window_params = [{transform_indices = @transform_0, window_bounds = array<i64: 256, 128>}, {transform_indices = @transform_1, window_bounds = array<i64: 128, 64>}, {transform_indices = @transform_2, window_bounds = array<i64: 1, 64>}, {transform_indices = @transform_3, window_bounds = array<i64: 256, 64>}]} {
    %c0 = arith.constant 0 : index
    %c0_0 = arith.constant 0 : index
    %0 = vector.load %arg2[%c0, %c0_0] : memref<256x128xbf16, #tpu.memory_space<vmem>>, vector<256x128xbf16>
    %c0_1 = arith.constant 0 : index
    %c0_2 = arith.constant 0 : index
    %1 = vector.load %arg3[%c0_1, %c0_2] : memref<128x64xbf16, #tpu.memory_space<vmem>>, vector<128x64xbf16>
    %cst = arith.constant dense<0.000000e+00> : vector<256x64xf32>
    %2 = tpu.matmul %0, %1, %cst {dimension_numbers = #tpu.dot_dimension_numbers<[1], [0], [0], [1], [0, 0, 1, 1], [], []>} : vector<256x128xbf16>, vector<128x64xbf16>, vector<256x64xf32> -> vector<256x64xf32>
    %c0_3 = arith.constant 0 : index
    %c0_4 = arith.constant 0 : index
    %3 = vector.load %arg4[%c0_3, %c0_4] : memref<1x64xf32, #tpu.memory_space<vmem>>, vector<1x64xf32>
    %4 = vector.broadcast %3 : vector<1x64xf32> to vector<256x64xf32>
    %5 = arith.addf %2, %4 : vector<256x64xf32>
    %cst_5 = arith.constant 0.000000e+00 : f32
    %6 = vector.broadcast %cst_5 : f32 to vector<256x64xf32>
    %7 = arith.cmpf oge, %5, %6 : vector<256x64xf32>
    %cst_6 = arith.constant 2.000000e-01 : f32
    %8 = vector.broadcast %cst_6 : f32 to vector<256x64xf32>
    %9 = arith.mulf %8, %5 : vector<256x64xf32>
    %10 = arith.select %7, %5, %9 : vector<256x64xi1>, vector<256x64xf32>
    %11 = arith.truncf %10 : vector<256x64xf32> to vector<256x64xbf16>
    %c0_7 = arith.constant 0 : index
    %c0_8 = arith.constant 0 : index
    %12 = vector.load %arg5[%c0_7, %c0_8] : memref<256x64xbf16, #tpu.memory_space<vmem>>, vector<256x64xbf16>
    tpu.vector_store %arg5[%c0_7, %c0_8], %11 {strides = array<i32>} : memref<256x64xbf16, #tpu.memory_space<vmem>>, vector<256x64xbf16>,
    return
  }
  func.func @transform_0(%arg0: i32, %arg1: i32) -> (i32, i32) {
    %c0_i32 = arith.constant 0 : i32
    %c0_i32_0 = arith.constant 0 : i32
    return %arg0, %c0_i32 : i32, i32
  }
  func.func @transform_1(%arg0: i32, %arg1: i32) -> (i32, i32) {
    %c0_i32 = arith.constant 0 : i32
    %c0_i32_0 = arith.constant 0 : i32
    return %c0_i32, %arg1 : i32, i32
  }
  func.func @transform_2(%arg0: i32, %arg1: i32) -> (i32, i32) {
    %c0_i32 = arith.constant 0 : i32
    %c0_i32_0 = arith.constant 0 : i32
    return %c0_i32, %arg1 : i32, i32
  }
  func.func @transform_3(%arg0: i32, %arg1: i32) -> (i32, i32) {
    %c0_i32 = arith.constant 0 : i32
    return %arg0, %arg1 : i32, i32
  }
}

module attributes {stable_mosaic.version = 11 : i64} {
  func.func @_fused_matmul_single_k(%arg0: i32, %arg1: i32, %arg2: memref<32x1792xbf16, #tpu.memory_space<vmem>>, %arg3: memref<1792x128xbf16, #tpu.memory_space<vmem>>, %arg4: memref<1x128xf32, #tpu.memory_space<vmem>>, %arg5: memref<32x128xbf16, #tpu.memory_space<vmem>>) attributes {dimension_semantics = [#tpu.dimension_semantics<parallel>, #tpu.dimension_semantics<parallel>], iteration_bounds = array<i64: 2, 1>, scalar_prefetch = 0 : i64, scratch_operands = 0 : i64, tpu.core_type = #tpu.core_type<tc>, window_params = [{transform_indices = @transform_0, window_bounds = array<i64: 32, 1792>}, {transform_indices = @transform_1, window_bounds = array<i64: 1792, 128>}, {transform_indices = @transform_2, window_bounds = array<i64: 1, 128>}, {transform_indices = @transform_3, window_bounds = array<i64: 32, 128>}]} {
    %c0 = arith.constant 0 : index
    %c0_0 = arith.constant 0 : index
    %0 = vector.load %arg2[%c0, %c0_0] : memref<32x1792xbf16, #tpu.memory_space<vmem>>, vector<32x1792xbf16>
    %c0_1 = arith.constant 0 : index
    %c0_2 = arith.constant 0 : index
    %1 = vector.load %arg3[%c0_1, %c0_2] : memref<1792x128xbf16, #tpu.memory_space<vmem>>, vector<1792x128xbf16>
    %cst = arith.constant dense<0.000000e+00> : vector<32x128xf32>
    %2 = tpu.matmul %0, %1, %cst {dimension_numbers = #tpu.dot_dimension_numbers<[1], [0], [0], [1], [0, 0, 1, 1], [], []>} : vector<32x1792xbf16>, vector<1792x128xbf16>, vector<32x128xf32> -> vector<32x128xf32>
    %c0_3 = arith.constant 0 : index
    %c0_4 = arith.constant 0 : index
    %3 = vector.load %arg4[%c0_3, %c0_4] : memref<1x128xf32, #tpu.memory_space<vmem>>, vector<1x128xf32>
    %4 = vector.broadcast %3 : vector<1x128xf32> to vector<32x128xf32>
    %5 = arith.addf %2, %4 : vector<32x128xf32>
    %cst_5 = arith.constant 0.000000e+00 : f32
    %6 = vector.broadcast %cst_5 : f32 to vector<32x128xf32>
    %7 = arith.cmpf oge, %5, %6 : vector<32x128xf32>
    %cst_6 = arith.constant 2.000000e-01 : f32
    %8 = vector.broadcast %cst_6 : f32 to vector<32x128xf32>
    %9 = arith.mulf %8, %5 : vector<32x128xf32>
    %10 = arith.select %7, %5, %9 : vector<32x128xi1>, vector<32x128xf32>
    %11 = arith.truncf %10 : vector<32x128xf32> to vector<32x128xbf16>
    %c0_7 = arith.constant 0 : index
    %c0_8 = arith.constant 0 : index
    %12 = vector.load %arg5[%c0_7, %c0_8] : memref<32x128xbf16, #tpu.memory_space<vmem>>, vector<32x128xbf16>
    tpu.vector_store %arg5[%c0_7, %c0_8], %11 {strides = array<i32>} : memref<32x128xbf16, #tpu.memory_space<vmem>>, vector<32x128xbf16>,
    return
  }
  func.func @transform_0(%arg0: i32, %arg1: i32) -> (i32, i32) {
    %c0_i32 = arith.constant 0 : i32
    %c0_i32_0 = arith.constant 0 : i32
    return %arg0, %c0_i32 : i32, i32
  }
  func.func @transform_1(%arg0: i32, %arg1: i32) -> (i32, i32) {
    %c0_i32 = arith.constant 0 : i32
    %c0_i32_0 = arith.constant 0 : i32
    return %c0_i32, %arg1 : i32, i32
  }
  func.func @transform_2(%arg0: i32, %arg1: i32) -> (i32, i32) {
    %c0_i32 = arith.constant 0 : i32
    %c0_i32_0 = arith.constant 0 : i32
    return %c0_i32, %arg1 : i32, i32
  }
  func.func @transform_3(%arg0: i32, %arg1: i32) -> (i32, i32) {
    %c0_i32 = arith.constant 0 : i32
    return %arg0, %arg1 : i32, i32
  }
}

</mosaic_0001>

<bundles_post_ra>
// kernel: discriminator_forward.2
= control target key start
LH: loop header
LB: loop body
LE: loop exit
PB: predicated region body
PF: predicated region fallthrough
CT: control target
= control target key end

     0   :  { %s1227_s12 = smov 0   ;;  %s1229_s13 = smov 0   ;;  %s1413_s0 = inlined_call_operand.vmem [shape: bf16[512,128], index: 0, kind: input, shape index: {}]   ;;  %s1414_s1 = inlined_call_operand.vmem [shape: bf16[128,64], index: 1, kind: input, shape index: {}]   ;;  %s1415_s2 = inlined_call_operand.vmem [shape: f32[1,64], index: 2, kind: input, shape index: {}]   ;;  %s1416_s3 = inlined_call_operand.vmem [shape: bf16[512,64], index: 3, kind: output, shape index: {}]  }
   0x1   :  { %s1231_s14 = smov 0  }
   0x2 LB: > { %s25_s15 = sadd.s32 1, %s1201_s13  ;;  %p951_p0 = scmp.ge.s32.totalorder %s1205_s14, 1  ;;  %s1205_s14 = sphi %s1231_s14, %s13_s14   ;;  %s1201_s13 = sphi %s1229_s13, %s1418_s13   ;;  %s1197_s12 = sphi %s1227_s12, %s1417_s12  }
   0x3   : > { %p27_p1 = scmp.ge.s32.totalorder %s25_s15, 2  ;;  %p169_p2 = scmp.lt.s32.totalorder %s1205_s14, 3 }
   0x5   : > { %s1420_s15 = smov (%p27_p1, %s25_s15), 0  ;;  %p170_p3 = pnand %p951_p0, %p169_p2 }
   0x6   : > { %v1159_v0 = vld [vmem:[%s1414_s1] sm:$0xff] (!%p170_p3)   ;;  %s952_s18 = sshll.u32 (!%p170_p3), %s1197_s12, 5  ;;  %v1160_v1 = vld [vmem:[%s1414_s1 + $0x8] sm:$0xff] (!%p170_p3)   ;;  %v1161_v2 = vld [vmem:[%s1414_s1 + $0x10] sm:$0xff] (!%p170_p3)   ;;  %vm810_vm0 = vcmask (!%p170_p3), 519168  }
   0x7   : > { %173 = sbr.rel (%p170_p3) target bundleno = 297 (0x129), region = 32  ;;  %p204_p4 = scmp.lt.s32.totalorder (!%p170_p3), %s952_s18, 63  ;;  %1071 = vmatprep.subr.bf16.mxu0 (!%p170_p3), %v1159_v0  ;;  %1119 = vmatprep.subr.bf16.mxu1 (!%p170_p3), %v1159_v0  ;;  %v1162_v3 = vld [vmem:[%s1414_s1 + $0x18] sm:$0xff] (!%p170_p3)   ;;  %v1163_v6 = vld [vmem:[%s1414_s1 + $0x20] sm:$0xff] (!%p170_p3)   ;;  %v1164_v7 = vld [vmem:[%s1414_s1 + $0x28] sm:$0xff] (!%p170_p3)  }
   0x8   : > { %1072 = vmatpush3.bf16.msra.mxu0 (!%p170_p3), %v1159_v0  ;;  %1127 = vmatpush3.bf16.msra.mxu1 (!%p170_p3), %v1159_v0  ;;  %v1165_v8 = vld [vmem:[%s1414_s1 + $0x30] sm:$0xff] (!%p170_p3)   ;;  %v1166_v9 = vld [vmem:[%s1414_s1 + $0x38] sm:$0xff] (!%p170_p3)   ;;  %v1298_v24 = vld [vmem:[%s1415_s2] ss:$0 sm:$0xff] (!%p170_p3) }
   0x9   : > { %1073 = vmatprep.subr.bf16.mxu0 (!%p170_p3), %v1160_v1  ;;  %1120 = vmatprep.subr.bf16.mxu1 (!%p170_p3), %v1160_v1 }
   0xc   : > { %1074 = vmatpush3.bf16.msra.mxu0 (!%p170_p3), %v1160_v1  ;;  %1128 = vmatpush3.bf16.msra.mxu1 (!%p170_p3), %v1160_v1 }
   0xd   : > { %1075 = vmatprep.subr.bf16.mxu0 (!%p170_p3), %v1161_v2  ;;  %1121 = vmatprep.subr.bf16.mxu1 (!%p170_p3), %v1161_v2 }
   0xe   : > { %s1422_s18 = smov (!%p204_p4, %s952_s18), 63 }
   0xf   : > { %s953_s23 = sshll.u32 %s1422_s18, 2 }
  0x10   : > { %s1262_s26 = scalar_lea.vmem %s1413_s0, %s953_s23  ;;  %1076 = vmatpush3.bf16.msra.mxu0 %v1161_v2  ;;  %1129 = vmatpush3.bf16.msra.mxu1 %v1161_v2  ;;  %s1309_s17 = scalar_lea.vmem %s1416_s3, %s953_s23 }
  0x11   : > { %v1167_v4 = vld [vmem:[%s1262_s26] sm:$0xff]   ;;  %1077 = vmatprep.subr.bf16.mxu0 %v1162_v3  ;;  %1122 = vmatprep.subr.bf16.mxu1 %v1162_v3  ;;  %v1169_v10 = vld [vmem:[%s1262_s26 + $0x8] sm:$0xff]   ;;  %v1171_v12 = vld [vmem:[%s1262_s26 + $0x10] sm:$0xff]  }
  0x12   : > { %v1168_v5 = vld [vmem:[%s1262_s26 + $0x40] sm:$0xff]   ;;  %1087 = vmatprep.mubr.bf16.mxu0 %v1167_v4  ;;  %v1170_v11 = vld [vmem:[%s1262_s26 + $0x48] sm:$0xff]   ;;  %v1172_v13 = vld [vmem:[%s1262_s26 + $0x50] sm:$0xff]  }
  0x13   : > { %1103 = vmatprep.mubr.bf16.mxu1 %v1168_v5  ;;  %v1173_v14 = vld [vmem:[%s1262_s26 + $0x18] sm:$0xff]   ;;  %v1175_v16 = vld [vmem:[%s1262_s26 + $0x20] sm:$0xff]   ;;  %v1177_v18 = vld [vmem:[%s1262_s26 + $0x28] sm:$0xff]  }
  0x14   : > { %1078 = vmatpush3.bf16.msra.mxu0 %v1162_v3  ;;  %1130 = vmatpush3.bf16.msra.mxu1 %v1162_v3  ;;  %v1174_v15 = vld [vmem:[%s1262_s26 + $0x58] sm:$0xff]   ;;  %v1176_v17 = vld [vmem:[%s1262_s26 + $0x60] sm:$0xff]   ;;  %v1178_v19 = vld [vmem:[%s1262_s26 + $0x68] sm:$0xff]  }
  0x15   : > { %1079 = vmatprep.subr.bf16.mxu0 %v1163_v6  ;;  %1123 = vmatprep.subr.bf16.mxu1 %v1163_v6  ;;  %v1179_v20 = vld [vmem:[%s1262_s26 + $0x30] sm:$0xff]   ;;  %v1181_v22 = vld [vmem:[%s1262_s26 + $0x38] sm:$0xff]  }
  0x16   : > { %v1180_v21 = vld [vmem:[%s1262_s26 + $0x70] sm:$0xff]   ;;  %v1182_v23 = vld [vmem:[%s1262_s26 + $0x78] sm:$0xff]  }
  0x18   : > { %1080 = vmatpush3.bf16.msra.mxu0 %v1163_v6  ;;  %1131 = vmatpush3.bf16.msra.mxu1 %v1163_v6 }
  0x19   : > { %1081 = vmatprep.subr.bf16.mxu0 %v1164_v7  ;;  %1124 = vmatprep.subr.bf16.mxu1 %v1164_v7 }
  0x1c   : > { %1082 = vmatpush3.bf16.msra.mxu0 %v1164_v7  ;;  %1132 = vmatpush3.bf16.msra.mxu1 %v1164_v7 }
  0x1d   : > { %1083 = vmatprep.subr.bf16.mxu0 %v1165_v8  ;;  %1125 = vmatprep.subr.bf16.mxu1 %v1165_v8 }
  0x20   : > { %1084 = vmatpush3.bf16.msra.mxu0 %v1165_v8  ;;  %1133 = vmatpush3.bf16.msra.mxu1 %v1165_v8 }
  0x21   : > { %1085 = vmatprep.subr.bf16.mxu0 %v1166_v9  ;;  %1126 = vmatprep.subr.bf16.mxu1 %v1166_v9 }
  0x24   : > { %1086 = vmatpush3.bf16.msra.mxu0 %v1166_v9  ;;  %1134 = vmatpush3.bf16.msra.mxu1 %v1166_v9 }
  0x27   : > { %1088 = vmatmul.mubr.bf16.vlgmr.msra.gmra.mrb[0].mxu0 %v1169_v10  ;;  %1104 = vmatmul.mubr.bf16.vlgmr.msra.gmra.mrb[0].mxu1 %v1170_v11 }
  0x28   : > { %1091 = vmatprep.mubr.bf16.mxu0 %v1171_v12  ;;  %1107 = vmatprep.mubr.bf16.mxu1 %v1172_v13 }
  0x2f   : > { %1092 = vmatmul.mubr.bf16.gmra.mrb[4].mxu0 %v1173_v14  ;;  %1108 = vmatmul.mubr.bf16.gmra.mrb[4].mxu1 %v1174_v15 }
  0x30   : > { %1095 = vmatprep.mubr.bf16.mxu0 %v1175_v16  ;;  %1111 = vmatprep.mubr.bf16.mxu1 %v1176_v17 }
  0x37   : > { %1096 = vmatmul.mubr.bf16.gmra.mrb[8].mxu0 %v1177_v18  ;;  %1112 = vmatmul.mubr.bf16.gmra.mrb[8].mxu1 %v1178_v19 }
  0x38   : > { %1099 = vmatprep.mubr.bf16.mxu0 %v1179_v20  ;;  %1115 = vmatprep.mubr.bf16.mxu1 %v1180_v21 }
  0x3f   : > { %1100 = vmatmul.mubr.bf16.gmra.mrb[12].mxu0 %v1181_v22  ;;  %1116 = vmatmul.mubr.bf16.gmra.mrb[12].mxu1 %v1182_v23 }
  0xfa   : > { %v1089_v25 = vpop.f32.mrb[0].mxu0  ;;  %v1105_v26 = vpop.f32.mrb[0].mxu1 }
  0xfb   : > { %v468_v27 = vadd.f32 %v1089_v25, %v1298_v24  ;;  %v532_v28 = vadd.f32 %v1105_v26, %v1298_v24  ;;  %v459_v29 = vpop.f32.mrb[1].mxu0  ;;  %v523_v30 = vpop.f32.mrb[1].mxu1 }
  0xfc   : > { %v460_v31 = vadd.f32 %v1298_v24, %v459_v29  ;;  %v524_v32 = vadd.f32 %v1298_v24, %v523_v30  ;;  %v1090_v33 = vpop.f32.mrb[2].mxu0  ;;  %v1106_v34 = vpop.f32.mrb[2].mxu1 }
  0xfd   : > { %vm588_vm1 = vcmp.ge.f32.partialorder %v468_v27, 0.0  ;;  %v620_v35 = vmul.f32 0.2, %v468_v27  ;;  %vm604_vm2 = vcmp.ge.f32.partialorder %v532_v28, 0.0  ;;  %v636_v36 = vmul.f32 0.2, %v532_v28 }
  0xfe   : > { %vm586_vm3 = vcmp.ge.f32.partialorder %v460_v31, 0.0  ;;  %v618_v37 = vmul.f32 0.2, %v460_v31  ;;  %vm602_vm4 = vcmp.ge.f32.partialorder %v524_v32, 0.0  ;;  %v634_v38 = vmul.f32 0.2, %v524_v32 }
  0xff   : > { %v652_v39 = vsel %vm588_vm1, %v468_v27, %v620_v35  ;;  %v668_v40 = vsel %vm604_vm2, %v532_v28, %v636_v36  ;;  %v471_v41 = vadd.f32 %v1090_v33, %v1298_v24  ;;  %v535_v42 = vadd.f32 %v1106_v34, %v1298_v24  ;;  %v462_v43 = vpop.f32.mrb[3].mxu0  ;;  %v526_v44 = vpop.f32.mrb[3].mxu1 }
 0x100   : > { %v1017_v45 = vpack.c.bf16 %v652_v39, %v652_v39  ;;  %v1033_v46 = vpack.c.bf16 %v668_v40, %v668_v40  ;;  %v650_v47 = vsel %vm586_vm3, %v460_v31, %v618_v37  ;;  %v666_v48 = vsel %vm602_vm4, %v524_v32, %v634_v38 }
 0x101   : > { %v1015_v49 = vpack.c.bf16 %v650_v47, %v650_v47  ;;  %v1031_v50 = vpack.c.bf16 %v666_v48, %v666_v48  ;;  %vm589_vm5 = vcmp.ge.f32.partialorder %v471_v41, 0.0  ;;  %v621_v51 = vmul.f32 0.2, %v471_v41 }
 0x102   : > { %813 = vst.msk [vmem:[%s1309_s17 + $0x8] sm:$0xf] %vm810_vm0, %v1017_v45  ;;  %829 = vst.msk [vmem:[%s1309_s17 + $0x48] sm:$0xf] %vm810_vm0, %v1033_v46  ;;  %vm605_vm6 = vcmp.ge.f32.partialorder %v535_v42, 0.0  ;;  %v463_v53 = vadd.f32 %v1298_v24, %v462_v43  ;;  %v527_v54 = vadd.f32 %v1298_v24, %v526_v44  ;;  %v1093_v55 = vpop.f32.mrb[4].mxu0 }
 0x103   : > { %v637_v52 = vmul.f32 0.2, %v535_v42  ;;  %v1109_v56 = vpop.f32.mrb[4].mxu1  ;;  %811 = vst.msk [vmem:[%s1309_s17] sm:$0xf] %vm810_vm0, %v1015_v49  ;;  %v653_v57 = vsel %vm589_vm5, %v471_v41, %v621_v51  ;;  %v484_v58 = vadd.f32 %v1093_v55, %v1298_v24  ;;  %v475_v60 = vpop.f32.mrb[5].mxu0 }
 0x104   : > { %827 = vst.msk [vmem:[%s1309_s17 + $0x40] sm:$0xf] %vm810_vm0, %v1031_v50  ;;  %v548_v59 = vadd.f32 %v1109_v56, %v1298_v24  ;;  %v539_v61 = vpop.f32.mrb[5].mxu1  ;;  %v1018_v62 = vpack.c.bf16 %v653_v57, %v653_v57  ;;  %vm587_vm7 = vcmp.ge.f32.partialorder %v463_v53, 0.0  ;;  %v619_v0 = vmul.f32 0.2, %v463_v53 }
 0x105   : > { %v669_v63 = vsel %vm605_vm6, %v535_v42, %v637_v52  ;;  %v1094_v1 = vpop.f32.mrb[6].mxu0  ;;  %v1110_v2 = vpop.f32.mrb[6].mxu1  ;;  %vm603_vm8 = vcmp.ge.f32.partialorder %v527_v54, 0.0  ;;  %v635_v4 = vmul.f32 0.2, %v527_v54  ;;  %vm592_vm9 = vcmp.ge.f32.partialorder %v484_v58, 0.0 }
 0x106   : > { %v1034_v3 = vpack.c.bf16 %v669_v63, %v669_v63  ;;  %v478_v5 = vpop.f32.mrb[7].mxu0  ;;  %v542_v6 = vpop.f32.mrb[7].mxu1  ;;  %814 = vst.msk [vmem:[%s1309_s17 + $0xc] sm:$0xf] %vm810_vm0, %v1018_v62  ;;  %v651_v7 = vsel %vm587_vm7, %v463_v53, %v619_v0  ;;  %v624_v8 = vmul.f32 0.2, %v484_v58  ;;  %v476_v12 = vadd.f32 %v1298_v24, %v475_v60 }
 0x107   : > { %vm608_vm10 = vcmp.ge.f32.partialorder %v548_v59, 0.0  ;;  %v640_v9 = vmul.f32 0.2, %v548_v59  ;;  %v1016_v10 = vpack.c.bf16 %v651_v7, %v651_v7  ;;  %v667_v11 = vsel %vm603_vm8, %v527_v54, %v635_v4 }
 0x108   : > { %830 = vst.msk [vmem:[%s1309_s17 + $0x4c] sm:$0xf] %vm810_vm0, %v1034_v3  ;;  %v540_v13 = vadd.f32 %v1298_v24, %v539_v61  ;;  %v1032_v14 = vpack.c.bf16 %v667_v11, %v667_v11  ;;  %v656_v15 = vsel %vm592_vm9, %v484_v58, %v624_v8  ;;  %v487_v17 = vadd.f32 %v1094_v1, %v1298_v24 }
 0x109   : > { %v672_v16 = vsel %vm608_vm10, %v548_v59, %v640_v9  ;;  %812 = vst.msk [vmem:[%s1309_s17 + $0x4] sm:$0xf] %vm810_vm0, %v1016_v10  ;;  %v1021_v18 = vpack.c.bf16 %v656_v15, %v656_v15  ;;  %vm590_vm11 = vcmp.ge.f32.partialorder %v476_v12, 0.0  ;;  %v622_v20 = vmul.f32 0.2, %v476_v12 }
 0x10a   : > { %v1037_v19 = vpack.c.bf16 %v672_v16, %v672_v16  ;;  %828 = vst.msk [vmem:[%s1309_s17 + $0x44] sm:$0xf] %vm810_vm0, %v1032_v14  ;;  %vm606_vm12 = vcmp.ge.f32.partialorder %v540_v13, 0.0  ;;  %v638_v21 = vmul.f32 0.2, %v540_v13  ;;  %vm593_vm13 = vcmp.ge.f32.partialorder %v487_v17, 0.0 }
 0x10b   : > { %v625_v22 = vmul.f32 0.2, %v487_v17  ;;  %817 = vst.msk [vmem:[%s1309_s17 + $0x18] sm:$0xf] %vm810_vm0, %v1021_v18  ;;  %v654_v23 = vsel %vm590_vm11, %v476_v12, %v622_v20  ;;  %v551_v25 = vadd.f32 %v1110_v2, %v1298_v24  ;;  %v479_v26 = vadd.f32 %v1298_v24, %v478_v5  ;;  %v1097_v28 = vpop.f32.mrb[8].mxu0  ;;  %v1113_v29 = vpop.f32.mrb[8].mxu1 }
 0x10c   : > { %833 = vst.msk [vmem:[%s1309_s17 + $0x58] sm:$0xf] %vm810_vm0, %v1037_v19  ;;  %v543_v27 = vadd.f32 %v1298_v24, %v542_v6  ;;  %v1019_v30 = vpack.c.bf16 %v654_v23, %v654_v23  ;;  %v670_v31 = vsel %vm606_vm12, %v540_v13, %v638_v21  ;;  %v500_v33 = vadd.f32 %v1097_v28, %v1298_v24  ;;  %v491_v34 = vpop.f32.mrb[9].mxu0  ;;  %v555_v35 = vpop.f32.mrb[9].mxu1 }
 0x10d   : > { %v657_v32 = vsel %vm593_vm13, %v487_v17, %v625_v22  ;;  %v1035_v36 = vpack.c.bf16 %v670_v31, %v670_v31  ;;  %vm609_vm14 = vcmp.ge.f32.partialorder %v551_v25, 0.0  ;;  %v641_v38 = vmul.f32 0.2, %v551_v25  ;;  %v1098_v39 = vpop.f32.mrb[10].mxu0  ;;  %v1114_v40 = vpop.f32.mrb[10].mxu1 }
 0x10e   : > { %v1022_v37 = vpack.c.bf16 %v657_v32, %v657_v32  ;;  %815 = vst.msk [vmem:[%s1309_s17 + $0x10] sm:$0xf] %vm810_vm0, %v1019_v30  ;;  %vm591_vm15 = vcmp.ge.f32.partialorder %v479_v26, 0.0  ;;  %v623_v41 = vmul.f32 0.2, %v479_v26  ;;  %vm607_vm1 = vcmp.ge.f32.partialorder %v543_v27, 0.0 }
 0x10f   : > { %v639_v42 = vmul.f32 0.2, %v543_v27  ;;  %831 = vst.msk [vmem:[%s1309_s17 + $0x50] sm:$0xf] %vm810_vm0, %v1035_v36  ;;  %v673_v43 = vsel %vm609_vm14, %v551_v25, %v641_v38  ;;  %vm596_vm2 = vcmp.ge.f32.partialorder %v500_v33, 0.0  ;;  %v564_v45 = vadd.f32 %v1113_v29, %v1298_v24  ;;  %v494_v46 = vpop.f32.mrb[11].mxu0 }
 0x110   : > { %818 = vst.msk [vmem:[%s1309_s17 + $0x1c] sm:$0xf] %vm810_vm0, %v1022_v37  ;;  %v628_v44 = vmul.f32 0.2, %v500_v33  ;;  %v558_v47 = vpop.f32.mrb[11].mxu1  ;;  %v1038_v48 = vpack.c.bf16 %v673_v43, %v673_v43  ;;  %v655_v49 = vsel %vm591_vm15, %v479_v26, %v623_v41  ;;  %v492_v51 = vadd.f32 %v1298_v24, %v491_v34 }
 0x111   : > { %v671_v50 = vsel %vm607_vm1, %v543_v27, %v639_v42  ;;  %v1020_v52 = vpack.c.bf16 %v655_v49, %v655_v49  ;;  %vm612_vm3 = vcmp.ge.f32.partialorder %v564_v45, 0.0  ;;  %v644_v56 = vmul.f32 0.2, %v564_v45 }
 0x112   : > { %v1036_v53 = vpack.c.bf16 %v671_v50, %v671_v50  ;;  %v660_v54 = vsel %vm596_vm2, %v500_v33, %v628_v44  ;;  %834 = vst.msk [vmem:[%s1309_s17 + $0x5c] sm:$0xf] %vm810_vm0, %v1038_v48  ;;  %vm594_vm4 = vcmp.ge.f32.partialorder %v492_v51, 0.0  ;;  %v626_v57 = vmul.f32 0.2, %v492_v51  ;;  %v1101_v58 = vpop.f32.mrb[12].mxu0 }
 0x113   : > { %v1025_v55 = vpack.c.bf16 %v660_v54, %v660_v54  ;;  %816 = vst.msk [vmem:[%s1309_s17 + $0x14] sm:$0xf] %vm810_vm0, %v1020_v52  ;;  %v556_v59 = vadd.f32 %v1298_v24, %v555_v35  ;;  %v503_v60 = vadd.f32 %v1098_v39, %v1298_v24  ;;  %v567_v61 = vadd.f32 %v1114_v40, %v1298_v24  ;;  %v1117_v63 = vpop.f32.mrb[12].mxu1  ;;  %v507_v0 = vpop.f32.mrb[13].mxu0 }
 0x114   : > { %832 = vst.msk [vmem:[%s1309_s17 + $0x54] sm:$0xf] %vm810_vm0, %v1036_v53  ;;  %v495_v62 = vadd.f32 %v1298_v24, %v494_v46  ;;  %v676_v1 = vsel %vm612_vm3, %v564_v45, %v644_v56  ;;  %v658_v2 = vsel %vm594_vm4, %v492_v51, %v626_v57  ;;  %v559_v3 = vadd.f32 %v1298_v24, %v558_v47  ;;  %v571_v5 = vpop.f32.mrb[13].mxu1  ;;  %v1102_v6 = vpop.f32.mrb[14].mxu0 }
 0x115   : > { %821 = vst.msk [vmem:[%s1309_s17 + $0x28] sm:$0xf] %vm810_vm0, %v1025_v55  ;;  %v516_v4 = vadd.f32 %v1101_v58, %v1298_v24  ;;  %v1041_v7 = vpack.c.bf16 %v676_v1, %v676_v1  ;;  %v1023_v8 = vpack.c.bf16 %v658_v2, %v658_v2  ;;  %vm610_vm5 = vcmp.ge.f32.partialorder %v556_v59, 0.0  ;;  %v1118_v10 = vpop.f32.mrb[14].mxu1  ;;  %v510_v11 = vpop.f32.mrb[15].mxu0 }
 0x116   : > { %v642_v9 = vmul.f32 0.2, %v556_v59  ;;  %vm597_vm6 = vcmp.ge.f32.partialorder %v503_v60, 0.0  ;;  %v629_v12 = vmul.f32 0.2, %v503_v60  ;;  %vm613_vm7 = vcmp.ge.f32.partialorder %v567_v61, 0.0 }
 0x117   : > { %v645_v13 = vmul.f32 0.2, %v567_v61  ;;  %837 = vst.msk [vmem:[%s1309_s17 + $0x68] sm:$0xf] %vm810_vm0, %v1041_v7  ;;  %819 = vst.msk [vmem:[%s1309_s17 + $0x20] sm:$0xf] %vm810_vm0, %v1023_v8  ;;  %v580_v28 = vadd.f32 %v1117_v63, %v1298_v24  ;;  %v508_v30 = vadd.f32 %v1298_v24, %v507_v0  ;;  %v572_v31 = vadd.f32 %v1298_v24, %v571_v5 }
 0x118   : > { %v674_v14 = vsel %vm610_vm5, %v556_v59, %v642_v9  ;;  %vm595_vm8 = vcmp.ge.f32.partialorder %v495_v62, 0.0  ;;  %v627_v15 = vmul.f32 0.2, %v495_v62  ;;  %vm611_vm9 = vcmp.ge.f32.partialorder %v559_v3, 0.0  ;;  %v574_v16 = vpop.f32.mrb[15].mxu1 }
 0x119   : > { %v1039_v17 = vpack.c.bf16 %v674_v14, %v674_v14  ;;  %v661_v18 = vsel %vm597_vm6, %v503_v60, %v629_v12  ;;  %v677_v19 = vsel %vm613_vm7, %v567_v61, %v645_v13  ;;  %v643_v20 = vmul.f32 0.2, %v559_v3 }
 0x11a   : > { %v1026_v21 = vpack.c.bf16 %v661_v18, %v661_v18  ;;  %v1042_v22 = vpack.c.bf16 %v677_v19, %v677_v19  ;;  %v659_v23 = vsel %vm595_vm8, %v495_v62, %v627_v15  ;;  %vm600_vm10 = vcmp.ge.f32.partialorder %v516_v4, 0.0 }
 0x11b   : > { %835 = vst.msk [vmem:[%s1309_s17 + $0x60] sm:$0xf] %vm810_vm0, %v1039_v17  ;;  %v1024_v25 = vpack.c.bf16 %v659_v23, %v659_v23  ;;  %v675_v26 = vsel %vm611_vm9, %v559_v3, %v643_v20  ;;  %v632_v27 = vmul.f32 0.2, %v516_v4  ;;  %v519_v32 = vadd.f32 %v1102_v6, %v1298_v24 }
 0x11c   : > { %822 = vst.msk [vmem:[%s1309_s17 + $0x2c] sm:$0xf] %vm810_vm0, %v1026_v21  ;;  %838 = vst.msk [vmem:[%s1309_s17 + $0x6c] sm:$0xf] %vm810_vm0, %v1042_v22  ;;  %v1040_v29 = vpack.c.bf16 %v675_v26, %v675_v26  ;;  %vm616_vm11 = vcmp.ge.f32.partialorder %v580_v28, 0.0  ;;  %v583_v35 = vadd.f32 %v1118_v10, %v1298_v24  ;;  %vm598_vm12 = vcmp.ge.f32.partialorder %v508_v30, 0.0 }
 0x11d   : > { %820 = vst.msk [vmem:[%s1309_s17 + $0x24] sm:$0xf] %vm810_vm0, %v1024_v25  ;;  %v664_v33 = vsel %vm600_vm10, %v516_v4, %v632_v27  ;;  %v648_v34 = vmul.f32 0.2, %v580_v28  ;;  %v630_v37 = vmul.f32 0.2, %v508_v30  ;;  %v511_v47 = vadd.f32 %v1298_v24, %v510_v11 }
 0x11e   : > { %836 = vst.msk [vmem:[%s1309_s17 + $0x64] sm:$0xf] %vm810_vm0, %v1040_v29  ;;  %v1029_v36 = vpack.c.bf16 %v664_v33, %v664_v33  ;;  %vm614_vm13 = vcmp.ge.f32.partialorder %v572_v31, 0.0  ;;  %v646_v39 = vmul.f32 0.2, %v572_v31  ;;  %vm601_vm14 = vcmp.ge.f32.partialorder %v519_v32, 0.0 }
 0x11f   : > { %v680_v38 = vsel %vm616_vm11, %v580_v28, %v648_v34  ;;  %v633_v40 = vmul.f32 0.2, %v519_v32  ;;  %v662_v42 = vsel %vm598_vm12, %v508_v30, %v630_v37  ;;  %vm617_vm15 = vcmp.ge.f32.partialorder %v583_v35, 0.0 }
 0x120   : > { %825 = vst.msk [vmem:[%s1309_s17 + $0x38] sm:$0xf] %vm810_vm0, %v1029_v36  ;;  %v1045_v41 = vpack.c.bf16 %v680_v38, %v680_v38  ;;  %v649_v43 = vmul.f32 0.2, %v583_v35  ;;  %v1027_v44 = vpack.c.bf16 %v662_v42, %v662_v42  ;;  %v678_v45 = vsel %vm614_vm13, %v572_v31, %v646_v39 }
 0x121   : > { %v665_v46 = vsel %vm601_vm14, %v519_v32, %v633_v40  ;;  %v1043_v48 = vpack.c.bf16 %v678_v45, %v678_v45  ;;  %v575_v51 = vadd.f32 %v1298_v24, %v574_v16  ;;  %vm599_vm1 = vcmp.ge.f32.partialorder %v511_v47, 0.0 }
 0x122   : > { %841 = vst.msk [vmem:[%s1309_s17 + $0x78] sm:$0xf] %vm810_vm0, %v1045_v41  ;;  %v1030_v49 = vpack.c.bf16 %v665_v46, %v665_v46  ;;  %v681_v50 = vsel %vm617_vm15, %v583_v35, %v649_v43  ;;  %823 = vst.msk [vmem:[%s1309_s17 + $0x30] sm:$0xf] %vm810_vm0, %v1027_v44  ;;  %v631_v53 = vmul.f32 0.2, %v511_v47 }
 0x123   : > { %v1046_v52 = vpack.c.bf16 %v681_v50, %v681_v50  ;;  %839 = vst.msk [vmem:[%s1309_s17 + $0x70] sm:$0xf] %vm810_vm0, %v1043_v48  ;;  %vm615_vm2 = vcmp.ge.f32.partialorder %v575_v51, 0.0  ;;  %v647_v54 = vmul.f32 0.2, %v575_v51 }
 0x124   : > { %826 = vst.msk [vmem:[%s1309_s17 + $0x3c] sm:$0xf] %vm810_vm0, %v1030_v49  ;;  %v663_v55 = vsel %vm599_vm1, %v511_v47, %v631_v53 }
 0x125   : > { %842 = vst.msk [vmem:[%s1309_s17 + $0x7c] sm:$0xf] %vm810_vm0, %v1046_v52  ;;  %v1028_v56 = vpack.c.bf16 %v663_v55, %v663_v55  ;;  %v679_v57 = vsel %vm615_vm2, %v575_v51, %v647_v54 }
 0x126   : > { %v1044_v58 = vpack.c.bf16 %v679_v57, %v679_v57 }
 0x127   : > { %824 = vst.msk [vmem:[%s1309_s17 + $0x34] sm:$0xf] %vm810_vm0, %v1028_v56 }
 0x128   : > { %840 = vst.msk [vmem:[%s1309_s17 + $0x74] sm:$0xf] %vm810_vm0, %v1044_v58 }
 0x129 PF: > { %s13_s14 = sadd.s32 1, %s1205_s14   ;;  %s1417_s12 = smov %s1201_s13 }
 0x12a   : > { %p10_p5 = scmp.ge.s32.totalorder %s13_s14, 4   ;;  %s1418_s13 = smov %s1420_s15 }
 0x12c   :  { %12 = sbr.rel (!%p10_p5) target bundleno = 2 (0x2), region = 68 }

// kernel: discriminator_forward.3
= control target key start
LH: loop header
LB: loop body
LE: loop exit
PB: predicated region body
PF: predicated region fallthrough
CT: control target
= control target key end

     0   :  { %s2385_s12 = smov 0   ;;  %s2387_s13 = smov 0   ;;  %s2794_s0 = inlined_call_operand.vmem [shape: bf16[64,1792], index: 0, kind: input, shape index: {}]   ;;  %s2795_s1 = inlined_call_operand.vmem [shape: bf16[1792,128], index: 1, kind: input, shape index: {}]   ;;  %s2796_s2 = inlined_call_operand.vmem [shape: f32[1,128], index: 2, kind: input, shape index: {}]   ;;  %s2797_s3 = inlined_call_operand.vmem [shape: bf16[64,128], index: 3, kind: output, shape index: {}]  }
   0x1   :  { %s2389_s14 = smov 0  }
   0x2 LB: > { %s25_s15 = sadd.s32 1, %s2359_s13  ;;  %p1783_p0 = scmp.ge.s32.totalorder %s2363_s14, 1  ;;  %s2363_s14 = sphi %s2389_s14, %s13_s14   ;;  %s2359_s13 = sphi %s2387_s13, %s2799_s13   ;;  %s2355_s12 = sphi %s2385_s12, %s2798_s12  }
   0x3   : > { %p27_p1 = scmp.ge.s32.totalorder %s25_s15, 2  ;;  %p170_p2 = scmp.lt.s32.totalorder %s2363_s14, 3 }
   0x5   : > { %s2801_s15 = smov (%p27_p1, %s25_s15), 0  ;;  %p171_p3 = pnand %p1783_p0, %p170_p2 }
   0x6   : > { %v2187_v0 = vld [vmem:[%s2795_s1 + $0x40] sm:$0xff] (!%p171_p3)   ;;  %v2191_v4 = vld [vmem:[%s2795_s1 + $0x48] sm:$0xff] (!%p171_p3)   ;;  %v2195_v8 = vld [vmem:[%s2795_s1 + $0x50] sm:$0xff] (!%p171_p3)   ;;  %s1784_s23 = sshll.u32 (!%p171_p3), %s2355_s12, 2 }
   0x7   : > { %174 = sbr.rel (%p171_p3) target bundleno = 362 (0x16a), region = 32  ;;  %v2188_v1 = vld [vmem:[%s2795_s1 + $0xc0] sm:$0xff] (!%p171_p3)   ;;  %1950 = vmatprep.subr.bf16.mxu0 (!%p171_p3), %v2187_v0  ;;  %v2192_v5 = vld [vmem:[%s2795_s1 + $0xc8] sm:$0xff] (!%p171_p3)   ;;  %v2196_v9 = vld [vmem:[%s2795_s1 + $0xd0] sm:$0xff] (!%p171_p3)   ;;  %p206_p4 = scmp.lt.s32.totalorder (!%p171_p3), %s1784_s23, 7 }
   0x8   : > { %v2189_v2 = vld [vmem:[%s2795_s1] sm:$0xff] (!%p171_p3)   ;;  %1978 = vmatprep.subr.bf16.mxu1 (!%p171_p3), %v2188_v1  ;;  %v2193_v6 = vld [vmem:[%s2795_s1 + $0x8] sm:$0xff] (!%p171_p3)   ;;  %v2197_v10 = vld [vmem:[%s2795_s1 + $0x10] sm:$0xff] (!%p171_p3)  }
   0x9   : > { %v2190_v3 = vld [vmem:[%s2795_s1 + $0x80] sm:$0xff] (!%p171_p3)   ;;  %1951 = vmatpush3.bf16.msra.mxu0 (!%p171_p3), %v2189_v2  ;;  %v2194_v7 = vld [vmem:[%s2795_s1 + $0x88] sm:$0xff] (!%p171_p3)   ;;  %v2198_v11 = vld [vmem:[%s2795_s1 + $0x90] sm:$0xff] (!%p171_p3)  }
   0xa   : > { %1979 = vmatpush3.bf16.msra.mxu1 (!%p171_p3), %v2190_v3  ;;  %1952 = vmatprep.subr.bf16.mxu0 (!%p171_p3), %v2191_v4  ;;  %v2199_v12 = vld [vmem:[%s2795_s1 + $0x58] sm:$0xff] (!%p171_p3)   ;;  %v2203_v16 = vld [vmem:[%s2795_s1 + $0x60] sm:$0xff] (!%p171_p3)   ;;  %v2207_v20 = vld [vmem:[%s2795_s1 + $0x68] sm:$0xff] (!%p171_p3)  }
   0xb   : > { %1980 = vmatprep.subr.bf16.mxu1 (!%p171_p3), %v2192_v5  ;;  %v2200_v13 = vld [vmem:[%s2795_s1 + $0xd8] sm:$0xff] (!%p171_p3)   ;;  %v2204_v17 = vld [vmem:[%s2795_s1 + $0xe0] sm:$0xff] (!%p171_p3)   ;;  %v2208_v21 = vld [vmem:[%s2795_s1 + $0xe8] sm:$0xff] (!%p171_p3)  }
   0xc   : > { %v2201_v14 = vld [vmem:[%s2795_s1 + $0x18] sm:$0xff] (!%p171_p3)   ;;  %v2205_v18 = vld [vmem:[%s2795_s1 + $0x20] sm:$0xff] (!%p171_p3)   ;;  %v2209_v22 = vld [vmem:[%s2795_s1 + $0x28] sm:$0xff] (!%p171_p3)  }
   0xd   : > { %1953 = vmatpush3.bf16.msra.mxu0 (!%p171_p3), %v2193_v6  ;;  %v2202_v15 = vld [vmem:[%s2795_s1 + $0x98] sm:$0xff] (!%p171_p3)   ;;  %v2206_v19 = vld [vmem:[%s2795_s1 + $0xa0] sm:$0xff] (!%p171_p3)   ;;  %v2210_v23 = vld [vmem:[%s2795_s1 + $0xa8] sm:$0xff] (!%p171_p3)  }
   0xe   : > { %1981 = vmatpush3.bf16.msra.mxu1 %v2194_v7  ;;  %1954 = vmatprep.subr.bf16.mxu0 %v2195_v8  ;;  %s2803_s23 = smov (!%p206_p4, %s1784_s23), 7  ;;  %v2211_v24 = vld [vmem:[%s2795_s1 + $0x70] sm:$0xff]   ;;  %v2215_v28 = vld [vmem:[%s2795_s1 + $0x78] sm:$0xff]   ;;  %v2225_v36 = vld [vmem:[%s2795_s1 + $0x140] sm:$0xff]  }
   0xf   : > { %1982 = vmatprep.subr.bf16.mxu1 %v2196_v9  ;;  %v2212_v25 = vld [vmem:[%s2795_s1 + $0xf0] sm:$0xff]   ;;  %s2162_s22 = smul.u32 56, %s2803_s23  ;;  %v2216_v29 = vld [vmem:[%s2795_s1 + $0xf8] sm:$0xff]   ;;  %v2226_v37 = vld [vmem:[%s2795_s1 + $0x1c0] sm:$0xff]  }
  0x10   : > { %v2213_v26 = vld [vmem:[%s2795_s1 + $0x30] sm:$0xff]   ;;  %v2217_v30 = vld [vmem:[%s2795_s1 + $0x38] sm:$0xff]   ;;  %v2227_v38 = vld [vmem:[%s2795_s1 + $0x100] sm:$0xff]  }
  0x11   : > { %1955 = vmatpush3.bf16.msra.mxu0 %v2197_v10  ;;  %v2214_v27 = vld [vmem:[%s2795_s1 + $0xb0] sm:$0xff]   ;;  %s2502_s6 = scalar_lea.vmem %s2794_s0, %s2162_s22  ;;  %v2218_v31 = vld [vmem:[%s2795_s1 + $0xb8] sm:$0xff]   ;;  %v2228_v39 = vld [vmem:[%s2795_s1 + $0x180] sm:$0xff]  }
  0x12   : > { %1983 = vmatpush3.bf16.msra.mxu1 %v2198_v11  ;;  %1956 = vmatprep.subr.bf16.mxu0 %v2199_v12  ;;  %v2219_v32 = vld [vmem:[%s2502_s6] ss:$56 sps:$4 sm:$0xff]   ;;  %v2221_v33 = vld [vmem:[%s2502_s6 + $0x4] ss:$56 sps:$4 sm:$0xff]   ;;  %v2229_v40 = vld [vmem:[%s2795_s1 + $0x148] sm:$0xff]  }
  0x13   : > { %1984 = vmatprep.subr.bf16.mxu1 %v2200_v13  ;;  %v2222_v34 = vld [vmem:[%s2502_s6 + $0x8] ss:$56 sps:$4 sm:$0xff]   ;;  %v2224_v35 = vld [vmem:[%s2502_s6 + $0xc] ss:$56 sps:$4 sm:$0xff]   ;;  %1332 = vmatprep.mubr.bf16.mxu0 %v2221_v33  ;;  %v2233_v44 = vld [vmem:[%s2795_s1 + $0x150] sm:$0xff]  }
  0x14   : > { %1381 = vmatprep.mubr.bf16.mxu1 %v2224_v35  ;;  %v2230_v41 = vld [vmem:[%s2795_s1 + $0x1c8] sm:$0xff]   ;;  %v2234_v45 = vld [vmem:[%s2795_s1 + $0x1d0] sm:$0xff]   ;;  %v2237_v48 = vld [vmem:[%s2795_s1 + $0x158] sm:$0xff]  }
  0x15   : > { %1957 = vmatpush3.bf16.msra.mxu0 %v2201_v14  ;;  %v2231_v42 = vld [vmem:[%s2795_s1 + $0x108] sm:$0xff]   ;;  %v2235_v46 = vld [vmem:[%s2795_s1 + $0x110] sm:$0xff]   ;;  %v2238_v49 = vld [vmem:[%s2795_s1 + $0x1d8] sm:$0xff]  }
  0x16   : > { %1985 = vmatpush3.bf16.msra.mxu1 %v2202_v15  ;;  %1958 = vmatprep.subr.bf16.mxu0 %v2203_v16  ;;  %v2232_v43 = vld [vmem:[%s2795_s1 + $0x188] sm:$0xff]   ;;  %v2236_v47 = vld [vmem:[%s2795_s1 + $0x190] sm:$0xff]   ;;  %v2239_v50 = vld [vmem:[%s2795_s1 + $0x118] sm:$0xff]  }
  0x17   : > { %1986 = vmatprep.subr.bf16.mxu1 %v2204_v17  ;;  %v2240_v51 = vld [vmem:[%s2795_s1 + $0x198] sm:$0xff]   ;;  %v2241_v52 = vld [vmem:[%s2795_s1 + $0x160] sm:$0xff]   ;;  %v2245_v56 = vld [vmem:[%s2502_s6 + $0x74] ss:$56 sps:$4 sm:$0xff]  }
  0x18   : > { %v2242_v53 = vld [vmem:[%s2795_s1 + $0x1e0] sm:$0xff]   ;;  %v2247_v57 = vld [vmem:[%s2795_s1 + $0x168] sm:$0xff]   ;;  %v2252_v62 = vld [vmem:[%s2502_s6 + $0x7c] ss:$56 sps:$4 sm:$0xff]  }
  0x19   : > { %1959 = vmatpush3.bf16.msra.mxu0 %v2205_v18  ;;  %v2243_v54 = vld [vmem:[%s2795_s1 + $0x120] sm:$0xff]   ;;  %v2248_v58 = vld [vmem:[%s2795_s1 + $0x1e8] sm:$0xff]   ;;  %v2254_v63 = vld [vmem:[%s2502_s6 + $0x78] ss:$56 sps:$4 sm:$0xff]  }
  0x1a   : > { %1987 = vmatpush3.bf16.msra.mxu1 %v2206_v19  ;;  %1960 = vmatprep.subr.bf16.mxu0 %v2207_v20  ;;  %v2244_v55 = vld [vmem:[%s2795_s1 + $0x1a0] sm:$0xff]   ;;  %v2249_v59 = vld [vmem:[%s2502_s6 + $0x70] ss:$56 sps:$4 sm:$0xff]   ;;  %v2259_v4 = vld [vmem:[%s2795_s1 + $0x178] sm:$0xff]  }
  0x1b   : > { %1988 = vmatprep.subr.bf16.mxu1 %v2208_v21  ;;  %v2250_v60 = vld [vmem:[%s2795_s1 + $0x128] sm:$0xff]   ;;  %v2255_v0 = vld [vmem:[%s2795_s1 + $0x170] sm:$0xff]   ;;  %v2260_v5 = vld [vmem:[%s2795_s1 + $0x1f8] sm:$0xff]  }
  0x1c   : > { %v2251_v61 = vld [vmem:[%s2795_s1 + $0x1a8] sm:$0xff]   ;;  %v2256_v1 = vld [vmem:[%s2795_s1 + $0x1f0] sm:$0xff]   ;;  %v2261_v6 = vld [vmem:[%s2795_s1 + $0x138] sm:$0xff]  }
  0x1d   : > { %1961 = vmatpush3.bf16.msra.mxu0 %v2209_v22  ;;  %v2257_v2 = vld [vmem:[%s2795_s1 + $0x130] sm:$0xff]   ;;  %v2262_v7 = vld [vmem:[%s2795_s1 + $0x1b8] sm:$0xff]   ;;  %v2269_v12 = vld [vmem:[%s2795_s1 + $0x240] sm:$0xff]  }
  0x1e   : > { %1989 = vmatpush3.bf16.msra.mxu1 %v2210_v23  ;;  %1962 = vmatprep.subr.bf16.mxu0 %v2211_v24  ;;  %v2258_v3 = vld [vmem:[%s2795_s1 + $0x1b0] sm:$0xff]   ;;  %v2270_v13 = vld [vmem:[%s2795_s1 + $0x2c0] sm:$0xff]   ;;  %v2273_v16 = vld [vmem:[%s2795_s1 + $0x248] sm:$0xff]  }
  0x1f   : > { %1990 = vmatprep.subr.bf16.mxu1 %v2212_v25  ;;  %v2263_v8 = vld [vmem:[%s2502_s6 + $0x10] ss:$56 sps:$4 sm:$0xff]   ;;  %v2265_v9 = vld [vmem:[%s2502_s6 + $0x14] ss:$56 sps:$4 sm:$0xff]   ;;  %v2271_v14 = vld [vmem:[%s2795_s1 + $0x200] sm:$0xff]  }
  0x20   : > { %v2266_v10 = vld [vmem:[%s2502_s6 + $0x18] ss:$56 sps:$4 sm:$0xff]   ;;  %v2268_v11 = vld [vmem:[%s2502_s6 + $0x1c] ss:$56 sps:$4 sm:$0xff]   ;;  %v2272_v15 = vld [vmem:[%s2795_s1 + $0x280] sm:$0xff]  }
  0x21   : > { %1963 = vmatpush3.bf16.msra.mxu0 %v2213_v26  ;;  %v2274_v17 = vld [vmem:[%s2795_s1 + $0x2c8] sm:$0xff]   ;;  %v2277_v20 = vld [vmem:[%s2502_s6 + $0x84] ss:$56 sps:$4 sm:$0xff]   ;;  %v2279_v21 = vld [vmem:[%s2502_s6 + $0x80] ss:$56 sps:$4 sm:$0xff]  }
  0x22   : > { %1991 = vmatpush3.bf16.msra.mxu1 %v2214_v27  ;;  %1964 = vmatprep.subr.bf16.mxu0 %v2215_v28  ;;  %v2275_v18 = vld [vmem:[%s2795_s1 + $0x208] sm:$0xff]   ;;  %v2280_v22 = vld [vmem:[%s2795_s1 + $0x250] sm:$0xff]   ;;  %v2287_v28 = vld [vmem:[%s2795_s1 + $0x258] sm:$0xff]  }
  0x23   : > { %1992 = vmatprep.subr.bf16.mxu1 %v2216_v29  ;;  %v2276_v19 = vld [vmem:[%s2795_s1 + $0x288] sm:$0xff]   ;;  %v2281_v23 = vld [vmem:[%s2795_s1 + $0x2d0] sm:$0xff]   ;;  %v2288_v29 = vld [vmem:[%s2795_s1 + $0x2d8] sm:$0xff]  }
  0x24   : > { %v2282_v24 = vld [vmem:[%s2502_s6 + $0x8c] ss:$56 sps:$4 sm:$0xff]   ;;  %v2284_v25 = vld [vmem:[%s2795_s1 + $0x210] sm:$0xff]   ;;  %v2286_v27 = vld [vmem:[%s2502_s6 + $0x88] ss:$56 sps:$4 sm:$0xff]  }
  0x25   : > { %1965 = vmatpush3.bf16.msra.mxu0 %v2217_v30  ;;  %v2285_v26 = vld [vmem:[%s2795_s1 + $0x290] sm:$0xff]   ;;  %v2289_v30 = vld [vmem:[%s2795_s1 + $0x218] sm:$0xff]   ;;  %v2292_v33 = vld [vmem:[%s2795_s1 + $0x2e0] sm:$0xff]  }
  0x26   : > { %1993 = vmatpush3.bf16.msra.mxu1 %v2218_v31  ;;  %2006 = vmatprep.subr.bf16.mxu0 %v2225_v36  ;;  %v2290_v31 = vld [vmem:[%s2795_s1 + $0x298] sm:$0xff]   ;;  %v2294_v35 = vld [vmem:[%s2795_s1 + $0x2a0] sm:$0xff]   ;;  %v2295_v36 = vld [vmem:[%s2795_s1 + $0x268] sm:$0xff]  }
  0x27   : > { %2034 = vmatprep.subr.bf16.mxu1 %v2226_v37  ;;  %v2296_v37 = vld [vmem:[%s2795_s1 + $0x2e8] sm:$0xff]  }
  0x28   : > { %1333 = vmatmul.mubr.bf16.vlgmr.msra.gmra.mrb[0].mxu0 %v2219_v32  ;;  %v2291_v32 = vld [vmem:[%s2795_s1 + $0x260] sm:$0xff]  }
  0x29   : > { %1382 = vmatmul.mubr.bf16.vlgmr.msra.gmra.mrb[0].mxu1 %v2222_v34  ;;  %2007 = vmatpush3.bf16.msra.mxu0 %v2227_v38  ;;  %v2293_v34 = vld [vmem:[%s2795_s1 + $0x220] sm:$0xff]   ;;  %v2297_v38 = vld [vmem:[%s2795_s1 + $0x228] sm:$0xff]  }
  0x2a   : > { %2035 = vmatpush3.bf16.msra.mxu1 %v2228_v39  ;;  %2008 = vmatprep.subr.bf16.mxu0 %v2229_v40  ;;  %v2298_v39 = vld [vmem:[%s2795_s1 + $0x2a8] sm:$0xff]   ;;  %v2299_v40 = vld [vmem:[%s2795_s1 + $0x270] sm:$0xff]  }
  0x2b   : > { %2036 = vmatprep.subr.bf16.mxu1 %v2230_v41  ;;  %1340 = vmatprep.mubr.bf16.mxu0 %v2245_v56  ;;  %v2300_v41 = vld [vmem:[%s2795_s1 + $0x2f0] sm:$0xff]  }
  0x2c   : > { %1389 = vmatprep.mubr.bf16.mxu1 %v2252_v62  ;;  %v2317_v56 = vld [vmem:[%s2502_s6 + $0x94] ss:$56 sps:$4 sm:$0xff]   ;;  %v2325_v62 = vld [vmem:[%s2795_s1 + $0x358] sm:$0xff]  }
  0x2d   : > { %2009 = vmatpush3.bf16.msra.mxu0 %v2231_v42  ;;  %v2301_v42 = vld [vmem:[%s2795_s1 + $0x230] sm:$0xff]  }
  0x2e   : > { %2037 = vmatpush3.bf16.msra.mxu1 %v2232_v43  ;;  %2010 = vmatprep.subr.bf16.mxu0 %v2233_v44  ;;  %v2302_v43 = vld [vmem:[%s2795_s1 + $0x2b0] sm:$0xff]   ;;  %v2303_v44 = vld [vmem:[%s2795_s1 + $0x278] sm:$0xff]  }
  0x2f   : > { %2038 = vmatprep.subr.bf16.mxu1 %v2234_v45  ;;  %v2304_v45 = vld [vmem:[%s2795_s1 + $0x2f8] sm:$0xff]  }
  0x30   : > { %1341 = vmatmul.mubr.bf16.gmra.mrb[4].mxu0 %v2249_v59  ;;  %v2321_v59 = vld [vmem:[%s2502_s6 + $0x9c] ss:$56 sps:$4 sm:$0xff]  }
  0x31   : > { %2011 = vmatpush3.bf16.msra.mxu0 %v2235_v46  ;;  %1390 = vmatmul.mubr.bf16.gmra.mrb[4].mxu1 %v2254_v63  ;;  %v2305_v46 = vld [vmem:[%s2795_s1 + $0x238] sm:$0xff]  }
  0x32   : > { %2039 = vmatpush3.bf16.msra.mxu1 %v2236_v47  ;;  %2012 = vmatprep.subr.bf16.mxu0 %v2237_v48  ;;  %v2306_v47 = vld [vmem:[%s2795_s1 + $0x2b8] sm:$0xff]  }
  0x33   : > { %2040 = vmatprep.subr.bf16.mxu1 %v2238_v49  ;;  %1430 = vmatprep.mubr.bf16.mxu0 %v2265_v9  ;;  %v2307_v48 = vld [vmem:[%s2502_s6 + $0x20] ss:$56 sps:$4 sm:$0xff]   ;;  %v2309_v49 = vld [vmem:[%s2502_s6 + $0x24] ss:$56 sps:$4 sm:$0xff]  }
  0x34   : > { %1479 = vmatprep.mubr.bf16.mxu1 %v2268_v11  ;;  %v2326_v63 = vld [vmem:[%s2795_s1 + $0x318] sm:$0xff]  }
  0x35   : > { %2013 = vmatpush3.bf16.msra.mxu0 %v2239_v50  ;;  %v2310_v50 = vld [vmem:[%s2502_s6 + $0x28] ss:$56 sps:$4 sm:$0xff]   ;;  %v2334_v9 = vld [vmem:[%s2795_s1 + $0x338] sm:$0xff]  }
  0x36   : > { %2041 = vmatpush3.bf16.msra.mxu1 %v2240_v51  ;;  %2014 = vmatprep.subr.bf16.mxu0 %v2241_v52  ;;  %v2312_v51 = vld [vmem:[%s2502_s6 + $0x2c] ss:$56 sps:$4 sm:$0xff]   ;;  %v2338_v11 = vld [vmem:[%s2502_s6 + $0xa0] ss:$56 sps:$4 sm:$0xff]  }
  0x37   : > { %2042 = vmatprep.subr.bf16.mxu1 %v2242_v53  ;;  %v2313_v52 = vld [vmem:[%s2795_s1 + $0x340] sm:$0xff]  }
  0x38   : > { %v2314_v53 = vld [vmem:[%s2795_s1 + $0x300] sm:$0xff]  }
  0x39   : > { %2015 = vmatpush3.bf16.msra.mxu0 %v2243_v54  ;;  %v2315_v54 = vld [vmem:[%s2795_s1 + $0x348] sm:$0xff]  }
  0x3a   : > { %2043 = vmatpush3.bf16.msra.mxu1 %v2244_v55  ;;  %2016 = vmatprep.subr.bf16.mxu0 %v2247_v57  ;;  %v2316_v55 = vld [vmem:[%s2795_s1 + $0x308] sm:$0xff]  }
  0x3b   : > { %2044 = vmatprep.subr.bf16.mxu1 %v2248_v58  ;;  %v2319_v57 = vld [vmem:[%s2502_s6 + $0x90] ss:$56 sps:$4 sm:$0xff]  }
  0x3c   : > { %v2320_v58 = vld [vmem:[%s2795_s1 + $0x350] sm:$0xff]  }
  0x3d   : > { %2017 = vmatpush3.bf16.msra.mxu0 %v2250_v60  ;;  %v2323_v60 = vld [vmem:[%s2795_s1 + $0x310] sm:$0xff]  }
  0x3e   : > { %2045 = vmatpush3.bf16.msra.mxu1 %v2251_v61  ;;  %2018 = vmatprep.subr.bf16.mxu0 %v2255_v0  ;;  %v2324_v61 = vld [vmem:[%s2502_s6 + $0x98] ss:$56 sps:$4 sm:$0xff]   ;;  %v2327_v0 = vld [vmem:[%s2795_s1 + $0x360] sm:$0xff]  }
  0x3f   : > { %2046 = vmatprep.subr.bf16.mxu1 %v2256_v1  ;;  %v2328_v1 = vld [vmem:[%s2795_s1 + $0x320] sm:$0xff]  }
  0x41   : > { %2019 = vmatpush3.bf16.msra.mxu0 %v2257_v2  ;;  %v2329_v2 = vld [vmem:[%s2795_s1 + $0x368] sm:$0xff]  }
  0x42   : > { %2047 = vmatpush3.bf16.msra.mxu1 %v2258_v3  ;;  %2020 = vmatprep.subr.bf16.mxu0 %v2259_v4  ;;  %v2330_v3 = vld [vmem:[%s2795_s1 + $0x328] sm:$0xff]  }
  0x43   : > { %2048 = vmatprep.subr.bf16.mxu1 %v2260_v5  ;;  %v2337_v4 = vld [vmem:[%s2502_s6 + $0x34] ss:$56 sps:$4 sm:$0xff]  }
  0x44   : > { %v2331_v5 = vld [vmem:[%s2795_s1 + $0x370] sm:$0xff]  }
  0x45   : > { %2021 = vmatpush3.bf16.msra.mxu0 %v2261_v6  ;;  %v2340_v6 = vld [vmem:[%s2502_s6 + $0xa4] ss:$56 sps:$4 sm:$0xff]  }
  0x46   : > { %2049 = vmatpush3.bf16.msra.mxu1 %v2262_v7  ;;  %2062 = vmatprep.subr.bf16.mxu0 %v2269_v12  ;;  %v2332_v7 = vld [vmem:[%s2795_s1 + $0x330] sm:$0xff]  }
  0x47   : > { %2090 = vmatprep.subr.bf16.mxu1 %v2270_v13 }
  0x48   : > { %1431 = vmatmul.mubr.bf16.vlgmr.msra.gmra.mrb[8].mxu0 %v2263_v8  ;;  %v2333_v8 = vld [vmem:[%s2795_s1 + $0x378] sm:$0xff]  }
  0x49   : > { %1480 = vmatmul.mubr.bf16.vlgmr.msra.gmra.mrb[8].mxu1 %v2266_v10  ;;  %2063 = vmatpush3.bf16.msra.mxu0 %v2271_v14  ;;  %v2335_v10 = vld [vmem:[%s2502_s6 + $0x30] ss:$56 sps:$4 sm:$0xff]   ;;  %v1788_v14 = vld [vmem:[%s2796_s2] ss:$0 sm:$0xff]  ;;  %s1787_s6 = sshll.u32 %s2803_s23, 2 }
  0x4a   : > { %2091 = vmatpush3.bf16.msra.mxu1 %v2272_v15  ;;  %2064 = vmatprep.subr.bf16.mxu0 %v2273_v16  ;;  %s226_s26 = scalar_lea.vmem %s2797_s3, %s1787_s6 }
  0x4b   : > { %2092 = vmatprep.subr.bf16.mxu1 %v2274_v17  ;;  %1438 = vmatprep.mubr.bf16.mxu0 %v2277_v20 }
  0x4c   : > { %1487 = vmatprep.mubr.bf16.mxu1 %v2282_v24 }
  0x4d   : > { %2065 = vmatpush3.bf16.msra.mxu0 %v2275_v18 }
  0x4e   : > { %2093 = vmatpush3.bf16.msra.mxu1 %v2276_v19  ;;  %2066 = vmatprep.subr.bf16.mxu0 %v2280_v22 }
  0x4f   : > { %2094 = vmatprep.subr.bf16.mxu1 %v2281_v23 }
  0x50   : > { %1439 = vmatmul.mubr.bf16.gmra.mrb[12].mxu0 %v2279_v21 }
  0x51   : > { %2067 = vmatpush3.bf16.msra.mxu0 %v2284_v25  ;;  %1488 = vmatmul.mubr.bf16.gmra.mrb[12].mxu1 %v2286_v27 }
  0x52   : > { %2095 = vmatpush3.bf16.msra.mxu1 %v2285_v26  ;;  %2068 = vmatprep.subr.bf16.mxu0 %v2287_v28 }
  0x53   : > { %2096 = vmatprep.subr.bf16.mxu1 %v2288_v29  ;;  %1528 = vmatprep.mubr.bf16.mxu0 %v2309_v49 }
  0x54   : > { %1577 = vmatprep.mubr.bf16.mxu1 %v2312_v51 }
  0x55   : > { %2069 = vmatpush3.bf16.msra.mxu0 %v2289_v30 }
  0x56   : > { %2097 = vmatpush3.bf16.msra.mxu1 %v2290_v31  ;;  %2070 = vmatprep.subr.bf16.mxu0 %v2291_v32 }
  0x57   : > { %2098 = vmatprep.subr.bf16.mxu1 %v2292_v33 }
  0x59   : > { %2071 = vmatpush3.bf16.msra.mxu0 %v2293_v34 }
  0x5a   : > { %2099 = vmatpush3.bf16.msra.mxu1 %v2294_v35  ;;  %2072 = vmatprep.subr.bf16.mxu0 %v2295_v36 }
  0x5b   : > { %2100 = vmatprep.subr.bf16.mxu1 %v2296_v37 }
  0x5d   : > { %2073 = vmatpush3.bf16.msra.mxu0 %v2297_v38 }
  0x5e   : > { %2101 = vmatpush3.bf16.msra.mxu1 %v2298_v39  ;;  %2074 = vmatprep.subr.bf16.mxu0 %v2299_v40 }
  0x5f   : > { %2102 = vmatprep.subr.bf16.mxu1 %v2300_v41 }
  0x61   : > { %2075 = vmatpush3.bf16.msra.mxu0 %v2301_v42 }
  0x62   : > { %2103 = vmatpush3.bf16.msra.mxu1 %v2302_v43  ;;  %2076 = vmatprep.subr.bf16.mxu0 %v2303_v44 }
  0x63   : > { %2104 = vmatprep.subr.bf16.mxu1 %v2304_v45 }
  0x65   : > { %2077 = vmatpush3.bf16.msra.mxu0 %v2305_v46 }
  0x66   : > { %2105 = vmatpush3.bf16.msra.mxu1 %v2306_v47  ;;  %2118 = vmatprep.subr.bf16.mxu0 %v2313_v52 }
  0x67   : > { %2146 = vmatprep.subr.bf16.mxu1 %v2313_v52 }
  0x68   : > { %1529 = vmatmul.mubr.bf16.vlgmr.msra.gmra.mrb[16].mxu0 %v2307_v48 }
  0x69   : > { %1578 = vmatmul.mubr.bf16.vlgmr.msra.gmra.mrb[16].mxu1 %v2310_v50  ;;  %2119 = vmatpush3.bf16.msra.mxu0 %v2314_v53 }
  0x6a   : > { %2154 = vmatpush3.bf16.msra.mxu1 %v2314_v53  ;;  %2120 = vmatprep.subr.bf16.mxu0 %v2315_v54 }
  0x6b   : > { %2147 = vmatprep.subr.bf16.mxu1 %v2315_v54  ;;  %1536 = vmatprep.mubr.bf16.mxu0 %v2317_v56 }
  0x6c   : > { %1585 = vmatprep.mubr.bf16.mxu1 %v2321_v59 }
  0x6d   : > { %2121 = vmatpush3.bf16.msra.mxu0 %v2316_v55 }
  0x6e   : > { %2155 = vmatpush3.bf16.msra.mxu1 %v2316_v55  ;;  %2122 = vmatprep.subr.bf16.mxu0 %v2320_v58 }
  0x6f   : > { %2148 = vmatprep.subr.bf16.mxu1 %v2320_v58 }
  0x70   : > { %1537 = vmatmul.mubr.bf16.gmra.mrb[20].mxu0 %v2319_v57 }
  0x71   : > { %2123 = vmatpush3.bf16.msra.mxu0 %v2323_v60  ;;  %1586 = vmatmul.mubr.bf16.gmra.mrb[20].mxu1 %v2324_v61 }
  0x72   : > { %2156 = vmatpush3.bf16.msra.mxu1 %v2323_v60  ;;  %2124 = vmatprep.subr.bf16.mxu0 %v2325_v62 }
  0x73   : > { %2149 = vmatprep.subr.bf16.mxu1 %v2325_v62  ;;  %1626 = vmatprep.mubr.bf16.mxu0 %v2337_v4 }
  0x74   : > { %1634 = vmatprep.mubr.bf16.mxu1 %v2340_v6 }
  0x75   : > { %2125 = vmatpush3.bf16.msra.mxu0 %v2326_v63 }
  0x76   : > { %2157 = vmatpush3.bf16.msra.mxu1 %v2326_v63  ;;  %2126 = vmatprep.subr.bf16.mxu0 %v2327_v0 }
  0x77   : > { %2150 = vmatprep.subr.bf16.mxu1 %v2327_v0 }
  0x79   : > { %2127 = vmatpush3.bf16.msra.mxu0 %v2328_v1 }
  0x7a   : > { %2158 = vmatpush3.bf16.msra.mxu1 %v2328_v1  ;;  %2128 = vmatprep.subr.bf16.mxu0 %v2329_v2 }
  0x7b   : > { %2151 = vmatprep.subr.bf16.mxu1 %v2329_v2 }
  0x7d   : > { %2129 = vmatpush3.bf16.msra.mxu0 %v2330_v3 }
  0x7e   : > { %2159 = vmatpush3.bf16.msra.mxu1 %v2330_v3  ;;  %2130 = vmatprep.subr.bf16.mxu0 %v2331_v5 }
  0x7f   : > { %2152 = vmatprep.subr.bf16.mxu1 %v2331_v5 }
  0x81   : > { %2131 = vmatpush3.bf16.msra.mxu0 %v2332_v7 }
  0x82   : > { %2160 = vmatpush3.bf16.msra.mxu1 %v2332_v7  ;;  %2132 = vmatprep.subr.bf16.mxu0 %v2333_v8 }
  0x83   : > { %2153 = vmatprep.subr.bf16.mxu1 %v2333_v8 }
  0x85   : > { %2133 = vmatpush3.bf16.msra.mxu0 %v2334_v9 }
  0x86   : > { %2161 = vmatpush3.bf16.msra.mxu1 %v2334_v9 }
  0x88   : > { %1627 = vmatmul.mubr.bf16.vlgmr.msra.gmra.mrb[24].mxu0 %v2335_v10 }
  0x89   : > { %1635 = vmatmul.mubr.bf16.vlgmr.msra.gmra.mrb[24].mxu1 %v2338_v11 }
  0xfb   : > { %v1966_v12 = vpop.f32.mrb[0].mxu0 }
  0xfc   : > { %v1994_v13 = vpop.f32.mrb[0].mxu1  ;;  %v1967_v15 = vpop.f32.mrb[1].mxu0 }
  0xfd   : > { %v1968_v16 = vadd.f32 %v1967_v15, %v1966_v12  ;;  %v1995_v17 = vpop.f32.mrb[1].mxu1  ;;  %v1969_v18 = vpop.f32.mrb[2].mxu0 }
  0xfe   : > { %v1996_v19 = vadd.f32 %v1995_v17, %v1994_v13  ;;  %v1997_v20 = vpop.f32.mrb[2].mxu1  ;;  %v1970_v21 = vpop.f32.mrb[3].mxu0 }
  0xff   : > { %v1335_v22 = vadd.f32 %v1968_v16, %v1788_v14  ;;  %v1971_v23 = vadd.f32 %v1970_v21, %v1969_v18  ;;  %v1998_v24 = vpop.f32.mrb[3].mxu1 }
 0x100   : > { %v1999_v25 = vadd.f32 %v1998_v24, %v1997_v20 }
 0x101   : > { %v1384_v26 = vadd.f32 %v1996_v19, %v1335_v22  ;;  %v1338_v27 = vadd.f32 %v1971_v23, %v1788_v14 }
 0x103   : > { %v1387_v28 = vadd.f32 %v1999_v25, %v1338_v27  ;;  %v1972_v29 = vpop.f32.mrb[4].mxu0 }
 0x104   : > { %v1973_v30 = vpop.f32.mrb[5].mxu0  ;;  %v2000_v35 = vpop.f32.mrb[4].mxu1 }
 0x105   : > { %v1974_v31 = vadd.f32 %v1973_v30, %v1972_v29  ;;  %v1975_v32 = vpop.f32.mrb[6].mxu0  ;;  %v2001_v37 = vpop.f32.mrb[5].mxu1 }
 0x106   : > { %v1976_v33 = vpop.f32.mrb[7].mxu0  ;;  %v2002_v39 = vadd.f32 %v2001_v37, %v2000_v35  ;;  %v2003_v40 = vpop.f32.mrb[6].mxu1 }
 0x107   : > { %v1343_v34 = vadd.f32 %v1974_v31, %v1788_v14  ;;  %v1977_v36 = vadd.f32 %v1976_v33, %v1975_v32  ;;  %v2004_v41 = vpop.f32.mrb[7].mxu1 }
 0x108   : > { %v2005_v43 = vadd.f32 %v2004_v41, %v2003_v40 }
 0x109   : > { %v1346_v38 = vadd.f32 %v1977_v36, %v1788_v14  ;;  %v1392_v42 = vadd.f32 %v2002_v39, %v1343_v34 }
 0x10b   : > { %v1395_v44 = vadd.f32 %v2005_v43, %v1346_v38 }
 0x11b   : > { %v2022_v45 = vpop.f32.mrb[8].mxu0 }
 0x11c   : > { %v2050_v46 = vpop.f32.mrb[8].mxu1  ;;  %v2023_v47 = vpop.f32.mrb[9].mxu0 }
 0x11d   : > { %v2024_v48 = vadd.f32 %v2023_v47, %v2022_v45  ;;  %v2051_v49 = vpop.f32.mrb[9].mxu1  ;;  %v2025_v50 = vpop.f32.mrb[10].mxu0 }
 0x11e   : > { %v2052_v51 = vadd.f32 %v2051_v49, %v2050_v46  ;;  %v2053_v52 = vpop.f32.mrb[10].mxu1  ;;  %v2026_v53 = vpop.f32.mrb[11].mxu0 }
 0x11f   : > { %v1433_v54 = vadd.f32 %v2024_v48, %v1384_v26  ;;  %v2027_v55 = vadd.f32 %v2026_v53, %v2025_v50  ;;  %v2054_v56 = vpop.f32.mrb[11].mxu1 }
 0x120   : > { %v2055_v57 = vadd.f32 %v2054_v56, %v2053_v52 }
 0x121   : > { %v1482_v58 = vadd.f32 %v2052_v51, %v1433_v54  ;;  %v1436_v59 = vadd.f32 %v2027_v55, %v1387_v28 }
 0x123   : > { %v1485_v60 = vadd.f32 %v2055_v57, %v1436_v59  ;;  %v2028_v61 = vpop.f32.mrb[12].mxu0 }
 0x124   : > { %v2029_v62 = vpop.f32.mrb[13].mxu0  ;;  %v2056_v4 = vpop.f32.mrb[12].mxu1 }
 0x125   : > { %v2030_v63 = vadd.f32 %v2029_v62, %v2028_v61  ;;  %v2031_v0 = vpop.f32.mrb[14].mxu0  ;;  %v2057_v6 = vpop.f32.mrb[13].mxu1 }
 0x126   : > { %v2032_v1 = vpop.f32.mrb[15].mxu0  ;;  %v2058_v7 = vadd.f32 %v2057_v6, %v2056_v4  ;;  %v2059_v8 = vpop.f32.mrb[14].mxu1 }
 0x127   : > { %v1441_v2 = vadd.f32 %v2030_v63, %v1392_v42  ;;  %v2033_v3 = vadd.f32 %v2032_v1, %v2031_v0  ;;  %v2060_v9 = vpop.f32.mrb[15].mxu1 }
 0x128   : > { %v2061_v11 = vadd.f32 %v2060_v9, %v2059_v8 }
 0x129   : > { %v1444_v5 = vadd.f32 %v2033_v3, %v1395_v44  ;;  %v1490_v10 = vadd.f32 %v2058_v7, %v1441_v2 }
 0x12b   : > { %v1493_v12 = vadd.f32 %v2061_v11, %v1444_v5 }
 0x13b   : > { %v2078_v13 = vpop.f32.mrb[16].mxu0 }
 0x13c   : > { %v2079_v14 = vpop.f32.mrb[17].mxu0  ;;  %v2106_v15 = vpop.f32.mrb[16].mxu1 }
 0x13d   : > { %v2080_v16 = vadd.f32 %v2079_v14, %v2078_v13  ;;  %v2081_v17 = vpop.f32.mrb[18].mxu0  ;;  %v2107_v18 = vpop.f32.mrb[17].mxu1 }
 0x13e   : > { %v2082_v19 = vpop.f32.mrb[19].mxu0  ;;  %v2108_v21 = vadd.f32 %v2107_v18, %v2106_v15  ;;  %v2109_v22 = vpop.f32.mrb[18].mxu1 }
 0x13f   : > { %v1531_v20 = vadd.f32 %v2080_v16, %v1482_v58  ;;  %v2083_v23 = vadd.f32 %v2082_v19, %v2081_v17  ;;  %v2110_v24 = vpop.f32.mrb[19].mxu1 }
 0x140   : > { %v2111_v27 = vadd.f32 %v2110_v24, %v2109_v22 }
 0x141   : > { %v1580_v25 = vadd.f32 %v2108_v21, %v1531_v20  ;;  %v1534_v26 = vadd.f32 %v2083_v23, %v1485_v60 }
 0x143   : > { %v1583_v28 = vadd.f32 %v2111_v27, %v1534_v26  ;;  %v2084_v29 = vpop.f32.mrb[20].mxu0 }
 0x144   : > { %v2085_v30 = vpop.f32.mrb[21].mxu0  ;;  %v2112_v33 = vpop.f32.mrb[20].mxu1 }
 0x145   : > { %v2086_v31 = vadd.f32 %v2085_v30, %v2084_v29  ;;  %v2087_v32 = vpop.f32.mrb[22].mxu0  ;;  %v2113_v37 = vpop.f32.mrb[21].mxu1 }
 0x146   : > { %v2088_v34 = vpop.f32.mrb[23].mxu0  ;;  %v2114_v38 = vadd.f32 %v2113_v37, %v2112_v33  ;;  %v2115_v39 = vpop.f32.mrb[22].mxu1 }
 0x147   : > { %v1539_v35 = vadd.f32 %v2086_v31, %v1490_v10  ;;  %v2089_v36 = vadd.f32 %v2088_v34, %v2087_v32  ;;  %v2116_v41 = vpop.f32.mrb[23].mxu1 }
 0x148   : > { %v2117_v43 = vadd.f32 %v2116_v41, %v2115_v39 }
 0x149   : > { %v1542_v40 = vadd.f32 %v2089_v36, %v1493_v12  ;;  %v1588_v42 = vadd.f32 %v2114_v38, %v1539_v35 }
 0x14b   : > { %v1591_v44 = vadd.f32 %v2117_v43, %v1542_v40 }
 0x15b   : > { %v2134_v45 = vpop.f32.mrb[24].mxu0 }
 0x15c   : > { %v2140_v46 = vpop.f32.mrb[24].mxu1  ;;  %v2135_v47 = vpop.f32.mrb[25].mxu0 }
 0x15d   : > { %v2136_v48 = vadd.f32 %v2135_v47, %v2134_v45  ;;  %v2141_v49 = vpop.f32.mrb[25].mxu1  ;;  %v2137_v50 = vpop.f32.mrb[26].mxu0 }
 0x15e   : > { %v2142_v51 = vadd.f32 %v2141_v49, %v2140_v46  ;;  %v2143_v52 = vpop.f32.mrb[26].mxu1  ;;  %v2138_v53 = vpop.f32.mrb[27].mxu0 }
 0x15f   : > { %v1629_v54 = vadd.f32 %v2136_v48, %v1580_v25  ;;  %v2139_v55 = vadd.f32 %v2138_v53, %v2137_v50  ;;  %v2144_v56 = vpop.f32.mrb[27].mxu1 }
 0x160   : > { %v1637_v57 = vadd.f32 %v2142_v51, %v1588_v42  ;;  %v2145_v58 = vadd.f32 %v2144_v56, %v2143_v52 }
 0x161   : > { %v1647_v59 = vmul.f32 0.2, %v1629_v54  ;;  %v1632_v60 = vadd.f32 %v2139_v55, %v1583_v28  ;;  %vm1643_vm0 = vcmp.ge.f32.partialorder %v1629_v54, 0.0 }
 0x162   : > { %v1649_v61 = vmul.f32 0.2, %v1637_v57  ;;  %v1640_v62 = vadd.f32 %v2145_v58, %v1591_v44  ;;  %vm1645_vm1 = vcmp.ge.f32.partialorder %v1637_v57, 0.0 }
 0x163   : > { %vm1644_vm2 = vcmp.ge.f32.partialorder %v1632_v60, 0.0  ;;  %v1648_v63 = vmul.f32 0.2, %v1632_v60  ;;  %v1651_v1 = vsel %vm1643_vm0, %v1629_v54, %v1647_v59 }
 0x164   : > { %vm1646_vm3 = vcmp.ge.f32.partialorder %v1640_v62, 0.0  ;;  %v1650_v0 = vmul.f32 0.2, %v1640_v62  ;;  %v1653_v3 = vsel %vm1645_vm1, %v1637_v57, %v1649_v61 }
 0x165   : > { %v1652_v2 = vsel %vm1644_vm2, %v1632_v60, %v1648_v63 }
 0x166   : > { %v1942_v4 = vpack.c.bf16 %v1652_v2, %v1651_v1  ;;  %v1654_v5 = vsel %vm1646_vm3, %v1640_v62, %v1650_v0 }
 0x167   : > { %v1947_v6 = vpack.c.bf16 %v1654_v5, %v1653_v3 }
 0x168   : > { %1943 = vst [vmem:[%s226_s26] sm:$0xff] %v1942_v4  }
 0x169   : > { %1949 = vst [vmem:[%s226_s26 + $0x8] sm:$0xff] %v1947_v6  }
 0x16a PF: > { %s13_s14 = sadd.s32 1, %s2363_s14   ;;  %s2798_s12 = smov %s2359_s13 }
 0x16b   : > { %p10_p5 = scmp.ge.s32.totalorder %s13_s14, 4   ;;  %s2799_s13 = smov %s2801_s15 }
 0x16d   :  { %12 = sbr.rel (!%p10_p5) target bundleno = 2 (0x2), region = 68 }

</bundles_post_ra>
